<compile_context>
chip_gen: v5e
topology: v5e:2x2
jax: 0.10.0
libtpu: 0.0.40
codegen_flags: <defaults>
</compile_context>

<pallas_src>
import math
import functools

import jax
import jax.numpy as jnp
from jax import lax
from jax.experimental import pallas as pl
from jax.experimental.pallas import tpu as pltpu


def _mha_kernel(q_ref, k_ref, v_ref,
                wq_ref, bq_ref, wk_ref, bk_ref, wv_ref, bv_ref,
                wo_ref, bo_ref,
                out_ref, *, h, d_k, d_v, scale):
    # Native-dtype operands feed the MXU; accumulate in f32.
    q = q_ref[0]                                   # (S, Dx)
    k = k_ref[0]                                   # (S, Dx)
    v = v_ref[0]                                   # (S, Dx)

    # Fused projections across all heads (single wide matmul each).
    # The 1/sqrt(d_k) scale is applied to qh (S x h*d_k), not to scores (S x S).
    qh_all = (jnp.dot(q, wq_ref[...], preferred_element_type=jnp.float32)
              + bq_ref[...]) * scale               # (S, h*d_k)
    kh_all = (jnp.dot(k, wk_ref[...], preferred_element_type=jnp.float32)
              + bk_ref[...])                       # (S, h*d_k)
    vh_all = (jnp.dot(v, wv_ref[...], preferred_element_type=jnp.float32)
              + bv_ref[...])                       # (S, h*d_v)

    # Per-head scaled dot-product attention on the resident projected tiles.
    dn = (((1,), (1,)), ((), ()))                  # contract last axes (no kh.T)
    ctx_parts = []
    for head in range(h):                          # static unroll: h tiny matmuls
        qh = qh_all[:, head * d_k:(head + 1) * d_k]
        kh = kh_all[:, head * d_k:(head + 1) * d_k]
        vh = vh_all[:, head * d_v:(head + 1) * d_v]
        scores = lax.dot_general(qh, kh, dn,
                                 preferred_element_type=jnp.float32)  # (S, S)
        scores = scores - jnp.max(scores, axis=-1, keepdims=True)
        p = jnp.exp(scores)
        p = p * pl.reciprocal(jnp.sum(p, axis=-1, keepdims=True), approx=True)
        ctx_parts.append(jnp.dot(p, vh, preferred_element_type=jnp.float32))

    # Head-major concat matches PyTorch's .transpose(1,2).view(B,S,h*d_v).
    ctx_all = jnp.concatenate(ctx_parts, axis=-1)  # (S, h*d_v)

    # Single fused output projection: contraction dim K = h*d_v.
    out = (jnp.dot(ctx_all, wo_ref[...], preferred_element_type=jnp.float32)
           + bo_ref[...])                          # (S, Dx)
    out_ref[0] = out.astype(out_ref.dtype)


def multi_headed_attention(query, key, value, params, *, h, d_k, d_v):
    """query/key/value: [B, S, x_dim]; params: dict of PyTorch-shaped weights."""
    B, S, Dx = query.shape
    assert key.shape == (B, S, Dx) and value.shape == (B, S, Dx)

    # --- glue: concatenated (all-heads) weight slabs, pre-transposed so the
    #     kernel computes x @ W directly.  nn.Linear weight is [out, in].
    #     Output-feature order is already [head, d] (matches .view(B,S,h,d)).
    wq = params["wq"].T                  # (Dx, h*d_k)
    wk = params["wk"].T                  # (Dx, h*d_k)
    wv = params["wv"].T                  # (Dx, h*d_v)
    wo = params["wo"].T                  # (h*d_v, Dx)
    bq = params["bq"].reshape(1, h * d_k)
    bk = params["bk"].reshape(1, h * d_k)
    bv = params["bv"].reshape(1, h * d_v)
    bo = params["bo"].reshape(1, Dx)

    scale = 1.0 / math.sqrt(d_k)

    # Full-array blocks with a constant index_map: weights stay VMEM-resident
    # across the batch grid (no per-step re-DMA).
    full = lambda arr: pl.BlockSpec(arr.shape, lambda b: tuple(0 for _ in arr.shape))

    kernel = functools.partial(_mha_kernel, h=h, d_k=d_k, d_v=d_v, scale=scale)

    out = pl.pallas_call(
        kernel,
        out_shape=jax.ShapeDtypeStruct((B, S, Dx), query.dtype),
        grid_spec=pltpu.PrefetchScalarGridSpec(
            num_scalar_prefetch=0,
            grid=(B,),
            in_specs=[
                pl.BlockSpec((1, S, Dx), lambda b: (b, 0, 0)),   # query
                pl.BlockSpec((1, S, Dx), lambda b: (b, 0, 0)),   # key
                pl.BlockSpec((1, S, Dx), lambda b: (b, 0, 0)),   # value
                full(wq), full(bq),
                full(wk), full(bk),
                full(wv), full(bv),
                full(wo), full(bo),
            ],
            out_specs=pl.BlockSpec((1, S, Dx), lambda b: (b, 0, 0)),
        ),
        compiler_params=pltpu.CompilerParams(
            dimension_semantics=("parallel",)),
    )(query, key, value, wq, bq, wk, bk, wv, bv, wo, bo)
    return out


def _reference(query, key, value, params, *, h, d_k, d_v):
    """Pure-JAX reference mirroring the PyTorch forward (dropout in eval)."""
    B, S, Dx = query.shape
    lin = lambda x, w, b: jnp.einsum("bsd,od->bso", x, w) + b
    q = lin(query, params["wq"], params["bq"]).reshape(B, S, h, d_k).transpose(0, 2, 1, 3)
    k = lin(key,   params["wk"], params["bk"]).reshape(B, S, h, d_k).transpose(0, 2, 1, 3)
    v = lin(value, params["wv"], params["bv"]).reshape(B, S, h, d_v).transpose(0, 2, 1, 3)
    scores = jnp.einsum("bhqd,bhkd->bhqk", q, k) / math.sqrt(d_k)
    p = jax.nn.softmax(scores, axis=-1)
    x = jnp.einsum("bhqk,bhkd->bhqd", p, v).transpose(0, 2, 1, 3).reshape(B, S, h * d_v)
    return jnp.einsum("bso,do->bsd", x, params["wo"]) + params["bo"]


def _init_params(key, *, h, d_k, d_v, x_dim, dtype=jnp.float32):
    """Deterministic PyTorch-Linear-style init: U(-1/sqrt(fan_in), 1/sqrt(fan_in))."""
    keys = jax.random.split(key, 8)
    def uni(k, shape, fan_in):
        bound = 1.0 / math.sqrt(fan_in)
        return jax.random.uniform(k, shape, dtype, minval=-bound, maxval=bound)
    return {
        "wq": uni(keys[0], (d_k * h, x_dim), x_dim),
        "bq": uni(keys[1], (d_k * h,), x_dim),
        "wk": uni(keys[2], (d_k * h, x_dim), x_dim),
        "bk": uni(keys[3], (d_k * h,), x_dim),
        "wv": uni(keys[4], (d_v * h, x_dim), x_dim),
        "bv": uni(keys[5], (d_v * h,), x_dim),
        "wo": uni(keys[6], (x_dim, d_v * h), d_v * h),
        "bo": uni(keys[7], (x_dim,), d_v * h),
    }


if __name__ == "__main__":
    B, S, X = 2, 8, 32
    H, DK, DV = 4, 8, 8

    root = jax.random.PRNGKey(0)
    kq, kk, kv, kp = jax.random.split(root, 4)
    query = jax.random.normal(kq, (B, S, X), jnp.float32)
    key_in = jax.random.normal(kk, (B, S, X), jnp.float32)
    value = jax.random.normal(kv, (B, S, X), jnp.float32)
    params = _init_params(kp, h=H, d_k=DK, d_v=DV, x_dim=X)

    out = multi_headed_attention(query, key_in, value, params, h=H, d_k=DK, d_v=DV)
    out = jax.block_until_ready(out)

    ref = _reference(query, key_in, value, params, h=H, d_k=DK, d_v=DV)
    assert out.shape == (B, S, X)
    # Slightly relaxed tolerance: softmax denominator uses the EUP approximate
    # reciprocal (pl.reciprocal(..., approx=True)).
    assert jnp.allclose(out, ref, atol=2e-3, rtol=2e-3), "mismatch vs reference"

    print("KERNEL_OK")
</pallas_src>

<mosaic_0001>
module attributes {stable_mosaic.version = 11 : i64} {
  func.func @_mha_kernel(%arg0: i32, %arg1: memref<1x8x32xf32, #tpu.memory_space<vmem>>, %arg2: memref<1x8x32xf32, #tpu.memory_space<vmem>>, %arg3: memref<1x8x32xf32, #tpu.memory_space<vmem>>, %arg4: memref<32x32xf32, #tpu.memory_space<vmem>>, %arg5: memref<1x32xf32, #tpu.memory_space<vmem>>, %arg6: memref<32x32xf32, #tpu.memory_space<vmem>>, %arg7: memref<1x32xf32, #tpu.memory_space<vmem>>, %arg8: memref<32x32xf32, #tpu.memory_space<vmem>>, %arg9: memref<1x32xf32, #tpu.memory_space<vmem>>, %arg10: memref<32x32xf32, #tpu.memory_space<vmem>>, %arg11: memref<1x32xf32, #tpu.memory_space<vmem>>, %arg12: memref<1x8x32xf32, #tpu.memory_space<vmem>>) attributes {dimension_semantics = [#tpu.dimension_semantics<parallel>], iteration_bounds = array<i64: 2>, scalar_prefetch = 0 : i64, scratch_operands = 0 : i64, tpu.core_type = #tpu.core_type<tc>, window_params = [{transform_indices = @transform_0, window_bounds = array<i64: 1, 8, 32>}, {transform_indices = @transform_1, window_bounds = array<i64: 1, 8, 32>}, {transform_indices = @transform_2, window_bounds = array<i64: 1, 8, 32>}, {pipeline_mode = #tpu.pipeline_mode<synchronous>, transform_indices = @transform_3, window_bounds = array<i64: 32, 32>}, {pipeline_mode = #tpu.pipeline_mode<synchronous>, transform_indices = @transform_4, window_bounds = array<i64: 1, 32>}, {pipeline_mode = #tpu.pipeline_mode<synchronous>, transform_indices = @transform_5, window_bounds = array<i64: 32, 32>}, {pipeline_mode = #tpu.pipeline_mode<synchronous>, transform_indices = @transform_6, window_bounds = array<i64: 1, 32>}, {pipeline_mode = #tpu.pipeline_mode<synchronous>, transform_indices = @transform_7, window_bounds = array<i64: 32, 32>}, {pipeline_mode = #tpu.pipeline_mode<synchronous>, transform_indices = @transform_8, window_bounds = array<i64: 1, 32>}, {pipeline_mode = #tpu.pipeline_mode<synchronous>, transform_indices = @transform_9, window_bounds = array<i64: 32, 32>}, {pipeline_mode = #tpu.pipeline_mode<synchronous>, transform_indices = @transform_10, window_bounds = array<i64: 1, 32>}, {transform_indices = @transform_11, window_bounds = array<i64: 1, 8, 32>}]} {
    %c0 = arith.constant 0 : index
    %c0_0 = arith.constant 0 : index
    %c0_1 = arith.constant 0 : index
    %0 = vector.load %arg1[%c0, %c0_0, %c0_1] : memref<1x8x32xf32, #tpu.memory_space<vmem>>, vector<1x8x32xf32>
    %1 = vector.shape_cast %0 : vector<1x8x32xf32> to vector<8x32xf32>
    %c0_2 = arith.constant 0 : index
    %c0_3 = arith.constant 0 : index
    %c0_4 = arith.constant 0 : index
    %2 = vector.load %arg2[%c0_2, %c0_3, %c0_4] : memref<1x8x32xf32, #tpu.memory_space<vmem>>, vector<1x8x32xf32>
    %3 = vector.shape_cast %2 : vector<1x8x32xf32> to vector<8x32xf32>
    %c0_5 = arith.constant 0 : index
    %c0_6 = arith.constant 0 : index
    %c0_7 = arith.constant 0 : index
    %4 = vector.load %arg3[%c0_5, %c0_6, %c0_7] : memref<1x8x32xf32, #tpu.memory_space<vmem>>, vector<1x8x32xf32>
    %5 = vector.shape_cast %4 : vector<1x8x32xf32> to vector<8x32xf32>
    %c0_8 = arith.constant 0 : index
    %c0_9 = arith.constant 0 : index
    %6 = vector.load %arg4[%c0_8, %c0_9] : memref<32x32xf32, #tpu.memory_space<vmem>>, vector<32x32xf32>
    %cst = arith.constant dense<0.000000e+00> : vector<8x32xf32>
    %7 = tpu.matmul %1, %6, %cst {dimension_numbers = #tpu.dot_dimension_numbers<[1], [0], [0], [1], [0, 0, 1, 1], [], []>} : vector<8x32xf32>, vector<32x32xf32>, vector<8x32xf32> -> vector<8x32xf32>
    %c0_10 = arith.constant 0 : index
    %c0_11 = arith.constant 0 : index
    %8 = vector.load %arg5[%c0_10, %c0_11] : memref<1x32xf32, #tpu.memory_space<vmem>>, vector<1x32xf32>
    %9 = vector.broadcast %8 : vector<1x32xf32> to vector<8x32xf32>
    %10 = arith.addf %7, %9 : vector<8x32xf32>
    %cst_12 = arith.constant 0.353553385 : f32
    %11 = vector.broadcast %cst_12 : f32 to vector<8x32xf32>
    %12 = arith.mulf %10, %11 : vector<8x32xf32>
    %c0_13 = arith.constant 0 : index
    %c0_14 = arith.constant 0 : index
    %13 = vector.load %arg6[%c0_13, %c0_14] : memref<32x32xf32, #tpu.memory_space<vmem>>, vector<32x32xf32>
    %cst_15 = arith.constant dense<0.000000e+00> : vector<8x32xf32>
    %14 = tpu.matmul %3, %13, %cst_15 {dimension_numbers = #tpu.dot_dimension_numbers<[1], [0], [0], [1], [0, 0, 1, 1], [], []>} : vector<8x32xf32>, vector<32x32xf32>, vector<8x32xf32> -> vector<8x32xf32>
    %c0_16 = arith.constant 0 : index
    %c0_17 = arith.constant 0 : index
    %15 = vector.load %arg7[%c0_16, %c0_17] : memref<1x32xf32, #tpu.memory_space<vmem>>, vector<1x32xf32>
    %16 = vector.broadcast %15 : vector<1x32xf32> to vector<8x32xf32>
    %17 = arith.addf %14, %16 : vector<8x32xf32>
    %c0_18 = arith.constant 0 : index
    %c0_19 = arith.constant 0 : index
    %18 = vector.load %arg8[%c0_18, %c0_19] : memref<32x32xf32, #tpu.memory_space<vmem>>, vector<32x32xf32>
    %cst_20 = arith.constant dense<0.000000e+00> : vector<8x32xf32>
    %19 = tpu.matmul %5, %18, %cst_20 {dimension_numbers = #tpu.dot_dimension_numbers<[1], [0], [0], [1], [0, 0, 1, 1], [], []>} : vector<8x32xf32>, vector<32x32xf32>, vector<8x32xf32> -> vector<8x32xf32>
    %c0_21 = arith.constant 0 : index
    %c0_22 = arith.constant 0 : index
    %20 = vector.load %arg9[%c0_21, %c0_22] : memref<1x32xf32, #tpu.memory_space<vmem>>, vector<1x32xf32>
    %21 = vector.broadcast %20 : vector<1x32xf32> to vector<8x32xf32>
    %22 = arith.addf %19, %21 : vector<8x32xf32>
    %23 = vector.extract_strided_slice %12 {offsets = [0, 0], sizes = [8, 8], strides = [1, 1]} : vector<8x32xf32> to vector<8x8xf32>
    %24 = vector.extract_strided_slice %17 {offsets = [0, 0], sizes = [8, 8], strides = [1, 1]} : vector<8x32xf32> to vector<8x8xf32>
    %25 = vector.extract_strided_slice %22 {offsets = [0, 0], sizes = [8, 8], strides = [1, 1]} : vector<8x32xf32> to vector<8x8xf32>
    %cst_23 = arith.constant dense<0.000000e+00> : vector<8x8xf32>
    %26 = tpu.matmul %23, %24, %cst_23 {dimension_numbers = #tpu.dot_dimension_numbers<[1], [1], [0], [0], [0, 0, 1, 0], [], []>} : vector<8x8xf32>, vector<8x8xf32>, vector<8x8xf32> -> vector<8x8xf32>
    %cst_24 = arith.constant dense<0xFF800000> : vector<8xf32>
    %27 = vector.multi_reduction <maximumf>, %26, %cst_24 [1] : vector<8x8xf32> to vector<8xf32>
    %28 = vector.shape_cast %27 : vector<8xf32> to vector<8x1xf32>
    %29 = vector.broadcast %28 : vector<8x1xf32> to vector<8x8xf32>
    %30 = arith.subf %26, %29 : vector<8x8xf32>
    %31 = math.exp %30 : vector<8x8xf32>
    %cst_25 = arith.constant dense<0.000000e+00> : vector<8xf32>
    %32 = vector.multi_reduction <add>, %31, %cst_25 [1] : vector<8x8xf32> to vector<8xf32>
    %33 = vector.shape_cast %32 : vector<8xf32> to vector<8x1xf32>
    %34 = tpu.reciprocal %33 {approx = true} : vector<8x1xf32> -> vector<8x1xf32>
    %35 = vector.broadcast %34 : vector<8x1xf32> to vector<8x8xf32>
    %36 = arith.mulf %31, %35 : vector<8x8xf32>
    %cst_26 = arith.constant dense<0.000000e+00> : vector<8x8xf32>
    %37 = tpu.matmul %36, %25, %cst_26 {dimension_numbers = #tpu.dot_dimension_numbers<[1], [0], [0], [1], [0, 0, 1, 1], [], []>} : vector<8x8xf32>, vector<8x8xf32>, vector<8x8xf32> -> vector<8x8xf32>
    %38 = vector.extract_strided_slice %12 {offsets = [0, 8], sizes = [8, 8], strides = [1, 1]} : vector<8x32xf32> to vector<8x8xf32>
    %39 = vector.extract_strided_slice %17 {offsets = [0, 8], sizes = [8, 8], strides = [1, 1]} : vector<8x32xf32> to vector<8x8xf32>
    %40 = vector.extract_strided_slice %22 {offsets = [0, 8], sizes = [8, 8], strides = [1, 1]} : vector<8x32xf32> to vector<8x8xf32>
    %cst_27 = arith.constant dense<0.000000e+00> : vector<8x8xf32>
    %41 = tpu.matmul %38, %39, %cst_27 {dimension_numbers = #tpu.dot_dimension_numbers<[1], [1], [0], [0], [0, 0, 1, 0], [], []>} : vector<8x8xf32>, vector<8x8xf32>, vector<8x8xf32> -> vector<8x8xf32>
    %cst_28 = arith.constant dense<0xFF800000> : vector<8xf32>
    %42 = vector.multi_reduction <maximumf>, %41, %cst_28 [1] : vector<8x8xf32> to vector<8xf32>
    %43 = vector.shape_cast %42 : vector<8xf32> to vector<8x1xf32>
    %44 = vector.broadcast %43 : vector<8x1xf32> to vector<8x8xf32>
    %45 = arith.subf %41, %44 : vector<8x8xf32>
    %46 = math.exp %45 : vector<8x8xf32>
    %cst_29 = arith.constant dense<0.000000e+00> : vector<8xf32>
    %47 = vector.multi_reduction <add>, %46, %cst_29 [1] : vector<8x8xf32> to vector<8xf32>
    %48 = vector.shape_cast %47 : vector<8xf32> to vector<8x1xf32>
    %49 = tpu.reciprocal %48 {approx = true} : vector<8x1xf32> -> vector<8x1xf32>
    %50 = vector.broadcast %49 : vector<8x1xf32> to vector<8x8xf32>
    %51 = arith.mulf %46, %50 : vector<8x8xf32>
    %cst_30 = arith.constant dense<0.000000e+00> : vector<8x8xf32>
    %52 = tpu.matmul %51, %40, %cst_30 {dimension_numbers = #tpu.dot_dimension_numbers<[1], [0], [0], [1], [0, 0, 1, 1], [], []>} : vector<8x8xf32>, vector<8x8xf32>, vector<8x8xf32> -> vector<8x8xf32>
    %53 = vector.extract_strided_slice %12 {offsets = [0, 16], sizes = [8, 8], strides = [1, 1]} : vector<8x32xf32> to vector<8x8xf32>
    %54 = vector.extract_strided_slice %17 {offsets = [0, 16], sizes = [8, 8], strides = [1, 1]} : vector<8x32xf32> to vector<8x8xf32>
    %55 = vector.extract_strided_slice %22 {offsets = [0, 16], sizes = [8, 8], strides = [1, 1]} : vector<8x32xf32> to vector<8x8xf32>
    %cst_31 = arith.constant dense<0.000000e+00> : vector<8x8xf32>
    %56 = tpu.matmul %53, %54, %cst_31 {dimension_numbers = #tpu.dot_dimension_numbers<[1], [1], [0], [0], [0, 0, 1, 0], [], []>} : vector<8x8xf32>, vector<8x8xf32>, vector<8x8xf32> -> vector<8x8xf32>
    %cst_32 = arith.constant dense<0xFF800000> : vector<8xf32>
    %57 = vector.multi_reduction <maximumf>, %56, %cst_32 [1] : vector<8x8xf32> to vector<8xf32>
    %58 = vector.shape_cast %57 : vector<8xf32> to vector<8x1xf32>
    %59 = vector.broadcast %58 : vector<8x1xf32> to vector<8x8xf32>
    %60 = arith.subf %56, %59 : vector<8x8xf32>
    %61 = math.exp %60 : vector<8x8xf32>
    %cst_33 = arith.constant dense<0.000000e+00> : vector<8xf32>
    %62 = vector.multi_reduction <add>, %61, %cst_33 [1] : vector<8x8xf32> to vector<8xf32>
    %63 = vector.shape_cast %62 : vector<8xf32> to vector<8x1xf32>
    %64 = tpu.reciprocal %63 {approx = true} : vector<8x1xf32> -> vector<8x1xf32>
    %65 = vector.broadcast %64 : vector<8x1xf32> to vector<8x8xf32>
    %66 = arith.mulf %61, %65 : vector<8x8xf32>
    %cst_34 = arith.constant dense<0.000000e+00> : vector<8x8xf32>
    %67 = tpu.matmul %66, %55, %cst_34 {dimension_numbers = #tpu.dot_dimension_numbers<[1], [0], [0], [1], [0, 0, 1, 1], [], []>} : vector<8x8xf32>, vector<8x8xf32>, vector<8x8xf32> -> vector<8x8xf32>
    %68 = vector.extract_strided_slice %12 {offsets = [0, 24], sizes = [8, 8], strides = [1, 1]} : vector<8x32xf32> to vector<8x8xf32>
    %69 = vector.extract_strided_slice %17 {offsets = [0, 24], sizes = [8, 8], strides = [1, 1]} : vector<8x32xf32> to vector<8x8xf32>
    %70 = vector.extract_strided_slice %22 {offsets = [0, 24], sizes = [8, 8], strides = [1, 1]} : vector<8x32xf32> to vector<8x8xf32>
    %cst_35 = arith.constant dense<0.000000e+00> : vector<8x8xf32>
    %71 = tpu.matmul %68, %69, %cst_35 {dimension_numbers = #tpu.dot_dimension_numbers<[1], [1], [0], [0], [0, 0, 1, 0], [], []>} : vector<8x8xf32>, vector<8x8xf32>, vector<8x8xf32> -> vector<8x8xf32>
    %cst_36 = arith.constant dense<0xFF800000> : vector<8xf32>
    %72 = vector.multi_reduction <maximumf>, %71, %cst_36 [1] : vector<8x8xf32> to vector<8xf32>
    %73 = vector.shape_cast %72 : vector<8xf32> to vector<8x1xf32>
    %74 = vector.broadcast %73 : vector<8x1xf32> to vector<8x8xf32>
    %75 = arith.subf %71, %74 : vector<8x8xf32>
    %76 = math.exp %75 : vector<8x8xf32>
    %cst_37 = arith.constant dense<0.000000e+00> : vector<8xf32>
    %77 = vector.multi_reduction <add>, %76, %cst_37 [1] : vector<8x8xf32> to vector<8xf32>
    %78 = vector.shape_cast %77 : vector<8xf32> to vector<8x1xf32>
    %79 = tpu.reciprocal %78 {approx = true} : vector<8x1xf32> -> vector<8x1xf32>
    %80 = vector.broadcast %79 : vector<8x1xf32> to vector<8x8xf32>
    %81 = arith.mulf %76, %80 : vector<8x8xf32>
    %cst_38 = arith.constant dense<0.000000e+00> : vector<8x8xf32>
    %82 = tpu.matmul %81, %70, %cst_38 {dimension_numbers = #tpu.dot_dimension_numbers<[1], [0], [0], [1], [0, 0, 1, 1], [], []>} : vector<8x8xf32>, vector<8x8xf32>, vector<8x8xf32> -> vector<8x8xf32>
    %83 = tpu.concatenate %37, %52, %67, %82 in 1 : vector<8x8xf32>, vector<8x8xf32>, vector<8x8xf32>, vector<8x8xf32> -> vector<8x32xf32>
    %c0_39 = arith.constant 0 : index
    %c0_40 = arith.constant 0 : index
    %84 = vector.load %arg10[%c0_39, %c0_40] : memref<32x32xf32, #tpu.memory_space<vmem>>, vector<32x32xf32>
    %cst_41 = arith.constant dense<0.000000e+00> : vector<8x32xf32>
    %85 = tpu.matmul %83, %84, %cst_41 {dimension_numbers = #tpu.dot_dimension_numbers<[1], [0], [0], [1], [0, 0, 1, 1], [], []>} : vector<8x32xf32>, vector<32x32xf32>, vector<8x32xf32> -> vector<8x32xf32>
    %c0_42 = arith.constant 0 : index
    %c0_43 = arith.constant 0 : index
    %86 = vector.load %arg11[%c0_42, %c0_43] : memref<1x32xf32, #tpu.memory_space<vmem>>, vector<1x32xf32>
    %87 = vector.broadcast %86 : vector<1x32xf32> to vector<8x32xf32>
    %88 = arith.addf %85, %87 : vector<8x32xf32>
    %c0_44 = arith.constant 0 : index
    %c0_45 = arith.constant 0 : index
    %c0_46 = arith.constant 0 : index
    %89 = vector.load %arg12[%c0_44, %c0_45, %c0_46] : memref<1x8x32xf32, #tpu.memory_space<vmem>>, vector<1x8x32xf32>
    %90 = vector.shape_cast %89 : vector<1x8x32xf32> to vector<8x32xf32>
    %91 = vector.shape_cast %88 : vector<8x32xf32> to vector<1x8x32xf32>
    tpu.vector_store %arg12[%c0_44, %c0_45, %c0_46], %91 {strides = array<i32>} : memref<1x8x32xf32, #tpu.memory_space<vmem>>, vector<1x8x32xf32>,
    return
  }
  func.func @transform_0(%arg0: i32) -> (i32, i32, i32) {
    %c0_i32 = arith.constant 0 : i32
    %c0_i32_0 = arith.constant 0 : i32
    %c0_i32_1 = arith.constant 0 : i32
    return %arg0, %c0_i32, %c0_i32_0 : i32, i32, i32
  }
  func.func @transform_1(%arg0: i32) -> (i32, i32, i32) {
    %c0_i32 = arith.constant 0 : i32
    %c0_i32_0 = arith.constant 0 : i32
    %c0_i32_1 = arith.constant 0 : i32
    return %arg0, %c0_i32, %c0_i32_0 : i32, i32, i32
  }
  func.func @transform_2(%arg0: i32) -> (i32, i32, i32) {
    %c0_i32 = arith.constant 0 : i32
    %c0_i32_0 = arith.constant 0 : i32
    %c0_i32_1 = arith.constant 0 : i32
    return %arg0, %c0_i32, %c0_i32_0 : i32, i32, i32
  }
  func.func @transform_3(%arg0: i32) -> (i32, i32) {
    %c0_i32 = arith.constant 0 : i32
    %c0_i32_0 = arith.constant 0 : i32
    %c0_i32_1 = arith.constant 0 : i32
    return %c0_i32, %c0_i32_0 : i32, i32
  }
  func.func @transform_4(%arg0: i32) -> (i32, i32) {
    %c0_i32 = arith.constant 0 : i32
    %c0_i32_0 = arith.constant 0 : i32
    %c0_i32_1 = arith.constant 0 : i32
    return %c0_i32, %c0_i32_0 : i32, i32
  }
  func.func @transform_5(%arg0: i32) -> (i32, i32) {
    %c0_i32 = arith.constant 0 : i32
    %c0_i32_0 = arith.constant 0 : i32
    %c0_i32_1 = arith.constant 0 : i32
    return %c0_i32, %c0_i32_0 : i32, i32
  }
  func.func @transform_6(%arg0: i32) -> (i32, i32) {
    %c0_i32 = arith.constant 0 : i32
    %c0_i32_0 = arith.constant 0 : i32
    %c0_i32_1 = arith.constant 0 : i32
    return %c0_i32, %c0_i32_0 : i32, i32
  }
  func.func @transform_7(%arg0: i32) -> (i32, i32) {
    %c0_i32 = arith.constant 0 : i32
    %c0_i32_0 = arith.constant 0 : i32
    %c0_i32_1 = arith.constant 0 : i32
    return %c0_i32, %c0_i32_0 : i32, i32
  }
  func.func @transform_8(%arg0: i32) -> (i32, i32) {
    %c0_i32 = arith.constant 0 : i32
    %c0_i32_0 = arith.constant 0 : i32
    %c0_i32_1 = arith.constant 0 : i32
    return %c0_i32, %c0_i32_0 : i32, i32
  }
  func.func @transform_9(%arg0: i32) -> (i32, i32) {
    %c0_i32 = arith.constant 0 : i32
    %c0_i32_0 = arith.constant 0 : i32
    %c0_i32_1 = arith.constant 0 : i32
    return %c0_i32, %c0_i32_0 : i32, i32
  }
  func.func @transform_10(%arg0: i32) -> (i32, i32) {
    %c0_i32 = arith.constant 0 : i32
    %c0_i32_0 = arith.constant 0 : i32
    %c0_i32_1 = arith.constant 0 : i32
    return %c0_i32, %c0_i32_0 : i32, i32
  }
  func.func @transform_11(%arg0: i32) -> (i32, i32, i32) {
    %c0_i32 = arith.constant 0 : i32
    %c0_i32_0 = arith.constant 0 : i32
    %c0_i32_1 = arith.constant 0 : i32
    return %arg0, %c0_i32, %c0_i32_0 : i32, i32, i32
  }
}

</mosaic_0001>

<bundles_post_ra>
// kernel: tpu_custom_call.1
= control target key start
LH: loop header
LB: loop body
LE: loop exit
PB: predicated region body
PF: predicated region fallthrough
CT: control target
= control target key end

     0   :  { %s1928_s0 = inlined_call_operand.hbm [shape: f32[2,8,32], index: 0, kind: input, shape index: {}]   ;;  %s1929_s1 = inlined_call_operand.hbm [shape: f32[2,8,32], index: 1, kind: input, shape index: {}]   ;;  %s1930_s2 = inlined_call_operand.hbm [shape: f32[2,8,32], index: 2, kind: input, shape index: {}]   ;;  %s1931_s3 = inlined_call_operand.hbm [shape: f32[32,32], index: 3, kind: input, shape index: {}]   ;;  %s1932_s4 = inlined_call_operand.vmem [shape: f32[1,32], index: 4, kind: input, shape index: {}]   ;;  %s1933_s5 = inlined_call_operand.hbm [shape: f32[32,32], index: 5, kind: input, shape index: {}]   ;;  %s1934_s6 = inlined_call_operand.vmem [shape: f32[1,32], index: 6, kind: input, shape index: {}]   ;;  %s1935_s7 = inlined_call_operand.hbm [shape: f32[32,32], index: 7, kind: input, shape index: {}]   ;;  %s1936_s8 = inlined_call_operand.vmem [shape: f32[1,32], index: 8, kind: input, shape index: {}]   ;;  %s1937_s9 = inlined_call_operand.hbm [shape: f32[32,32], index: 9, kind: input, shape index: {}]   ;;  %s1938_s10 = inlined_call_operand.vmem [shape: f32[1,32], index: 10, kind: input, shape index: {}]   ;;  %s1939_s11 = inlined_call_operand.hbm [shape: f32[2,8,32], index: 11, kind: output, shape index: {}]  }
   0x1   :  { %1951 = sst [smem:[#allocation25_spill]] %s1929_s1 }
   0x2   :  { %1952 = sst [smem:[#allocation26_spill]] %s1931_s3 }
   0x3   :  { %1953 = sst [smem:[#allocation27_spill]] %s1933_s5 }
   0x4   :  { %1954 = sst [smem:[#allocation28_spill]] %s1935_s7 }
   0x5   :  { %1955 = sst [smem:[#allocation29_spill]] %s1937_s9 }
   0x6   :  { %1956 = sst [smem:[#allocation30_spill]] %s1938_s10 }
   0x7   :  { %16 = vsyncpa [#allocation3], 0 }
   0x8   :  { %18 = vsyncpa [#allocation3 + $0x1], 0 }
   0x9   :  { %19 = vsyncpa [#allocation6], 0 }
   0xa   :  { %21 = vsyncpa [#allocation6 + $0x1], 0 }
   0xb   :  { %22 = vsyncpa [#allocation9], 0 }
   0xc   :  { %23 = vsyncpa [#allocation12], 0 }
   0xd   :  { %24 = vsyncpa [#allocation4], 0 }
   0xe   :  { %26 = vsyncpa [#allocation4 + $0x1], 0  ;;  %s1645_s17 = smov 0   ;;  %s1647_s18 = smov 0  }
   0xf   :  { %s1649_s19 = smov 0   ;;  %s1651_s20 = smov 0  }
  0x10 LB: > { %1957 = sst [smem:[#allocation20_spill]] %s1559_s17  ;;  %s1669_s24 = sadd.s32 4294967295, %s1571_s20   ;;  %s1571_s20 = sphi %s1651_s20, %s1985_s20   ;;  %s1567_s19 = sphi %s1649_s19, %s1989_s19   ;;  %s1563_s18 = sphi %s1647_s18, %s1988_s18   ;;  %s1559_s17 = sphi %s1645_s17, %s1987_s17  }
  0x11   : > { %1958 = sst [smem:[#allocation21_spill]] %s1571_s20  ;;  %p1117_p0 = scmp.ge.s32.totalorder %s1571_s20, 1 }
  0x12   : > { %s1959_s3 = sld [smem:[#allocation26_spill]]  ;;  %p1950_p1 = scmp.eq.s32.totalorder %s1669_s24, 0 }
  0x13   : > { %p309_p2 = scmp.lt.s32.totalorder %s1571_s20, 3  ;;  %s1573_s26 = smov [#allocation8]  }
  0x14   : > { %s322_s27 = sshll.u32 %s1573_s26, 4  ;;  %s1961_s7 = sld [smem:[#allocation28_spill]]  ;;  %s323_s27 = int_to_ptr.vmem [resolvable:$true] %s322_s27 }
  0x15   : > { %p1674_p3 = pnand %p1117_p0, %p309_p2  ;;  %s1574_s13 = smov [#allocation11]  }
  0x16   : > { %s356_s14 = sshll.u32 %s1574_s13, 4  ;;  %s1940_s15 = smov 128   ;;  %s357_s14 = int_to_ptr.vmem [resolvable:$true] %s356_s14 }
  0x17   : > { %p1182_p4 = pneg %p1674_p3  ;;  %s1942_s16 = smov 8  }
  0x18   : > { %s320_s23 = sshll.u32 %s1959_s3, 4  ;;  %s1116_s21 = sadd.s32 4294967294, %s1571_s20   ;;  %s321_s23 = int_to_ptr.hbm [resolvable:$true] %s320_s23 }
  0x19   : > { %p1686_p6 = pnand %p1182_p4, %p1950_p1  ;;  %s1702_s22 = sadd.s32 1, %s1571_s20  }
  0x1a   : > { %s354_s30 = sshll.u32 %s1961_s7, 4  ;;  %1963 = sst [smem:[#allocation22_spill]] %s1702_s22  ;;  %s355_s30 = int_to_ptr.hbm [resolvable:$true] %s354_s30 }
  0x1b   : > { %1185 = dma.hbm_to_vmem [thread:$0]  (!%p1686_p6), %s321_s23, 512, %s323_s27, [#allocation9], %s1940_s15, %s1940_s15, %s1942_s16  }
  0x1c   : > { %1191 = dma.hbm_to_vmem [thread:$0]  (!%p1686_p6), %s355_s30, 512, %s357_s14, [#allocation12], %s1940_s15, %s1940_s15, %s1942_s16  }
  0x1d   : > { %s36_s26 = ssub.s32 %s1571_s20, %s1702_s22  ;;  %s39_s28 = sadd.s32 1, %s1567_s19 }
  0x1e   : > { %p37_p7 = scmp.eq.s32.totalorder %s36_s26, 0  ;;  %p46_p8 = scmp.ne.s32.totalorder %s1567_s19, %s1563_s18 }
  0x1f   : > { %p47_p9 = scmp.eq.s32.totalorder %s1571_s20, 0  ;;  %p52_p10 = scmp.ne.s32.totalorder %s1563_s18, %s1559_s17 }
  0x20   : > { %s1713_s23 = scalar_select %p37_p7, %s1567_s19, %s39_s28  }
  0x21   : > { %p48_p11 = por %p47_p9, %p46_p8  ;;  %p1717_p12 = por %p1950_p1, %p52_p10 }
  0x22   : > { %1964 = sst [smem:[#allocation23_spill]] %s1713_s23  ;;  %p296_p13 = scmp.eq.s32.totalorder %s1669_s24, 1 }
  0x23   : > { %p302_p0 = scmp.eq.s32.totalorder %s1116_s21, 1  ;;  %p1213_p2 = scmp.lt.s32.totalorder %s1571_s20, 2 }
  0x24   : > { %s1946_s29 = sand.u32 1, %s1567_s19   ;;  %p1724_p4 = por %p296_p13, %p46_p8 }
  0x25   : > { %p1728_p5 = por %p302_p0, %p52_p10  ;;  %s1734_s14 = sshll.u32 %s1946_s29, 3 }
  0x26   : > { %s1737_s26 = sshll.u32 %s1571_s20, 3  ;;  %p1739_p7 = pnand %p1213_p2, %p48_p11 }
  0x27   : > { %s1967_s13 = scalar_select %p1728_p5, 1, 0 }
  0x28   : > { %s409_s21 = sand.u32 1, %s1571_s20   ;;  %s1970_s1 = sld [smem:[#allocation25_spill]] }
  0x29   : > { %1968 = sst [smem:[#allocation24_spill]] %s1967_s13  ;;  %s413_s23 = scalar_lea.vmem [#allocation5], %s1734_s14 }
  0x2a   : > { %s421_s22 = sshll.u32 %s413_s23, 4  ;;  %s1749_s29 = scalar_lea.sflag [#allocation6], %s409_s21  ;;  %s422_s22 = int_to_ptr.vmem [resolvable:$true] %s421_s22 }
  0x2b   : > { %p1347_p9 = pneg %p1739_p7 }
  0x2e   : > { %s417_s3 = scalar_lea.hbm %s1970_s1, %s1737_s26 }
  0x2f   : > { %s419_s7 = sshll.u32 %s417_s3, 4  ;;  %s1350_s3 = scalar_lea.hbm %s1970_s1, 16  ;;  %s420_s7 = int_to_ptr.hbm [resolvable:$true] %s419_s7 }
  0x30   : > { %s1343_s13 = sshra.s32 %s420_s7, 4  ;;  %s1344_s13 = int_to_ptr.hbm [resolvable:$true] %s1343_s13 }
  0x31   : > { %s1345_s17 = scalar_lea.hbm %s1344_s13, 8  ;;  %p1351_p13 = scmp.lt.s32.totalorder %s1344_s13, %s1970_s1 }
  0x32   : > { %p1346_p8 = scmp.ne.s32.totalorder %s1344_s13, %s1345_s17  ;;  %p1352_p0 = scmp.lt.s32.totalorder %s1350_s3, %s1345_s17 }
  0x34   : > { %p1348_p10 = pnand %p1347_p9, %p1346_p8  ;;  %p1353_p2 = por %p1352_p0, %p1351_p13 }
  0x36   : > { %p1349_p11 = pneg %p1348_p10 }
  0x38   : > { %p1354_p1 = pnand %p1353_p2, %p1349_p11 }
  0x3a   : > { %1357 = shalt.err (!%p1354_p1)
}
  0x3b   : > { %1201 = dma.hbm_to_vmem [thread:$0]  (!%p1739_p7), %s420_s7, 128, %s422_s22, %s1749_s29  }
  0x3c   : > { %s1971_s5 = sld [smem:[#allocation27_spill]]  ;;  %s1577_s15 = smov [#allocation10]  }
  0x3d   : > { %s339_s13 = sshll.u32 %s1577_s15, 4  ;;  %s1972_s9 = sld [smem:[#allocation29_spill]]  ;;  %s340_s13 = int_to_ptr.vmem [resolvable:$true] %s339_s13 }
  0x3e   : > { %s1973_s23 = smov 8   ;;  %s1974_s1 = smov 128  }
  0x3f   : > { %s1578_s7 = smov [#allocation13]   ;;  %s398_s15 = scalar_lea.hbm %s1928_s0, %s1737_s26 }
  0x40   : > { %s373_s22 = sshll.u32 %s1578_s7, 4  ;;  %s394_s17 = scalar_lea.vmem [#allocation2], %s1734_s14  ;;  %s374_s22 = int_to_ptr.vmem [resolvable:$true] %s373_s22 }
  0x41   : > { %s402_s3 = sshll.u32 %s394_s17, 4  ;;  %s403_s3 = int_to_ptr.vmem [resolvable:$true] %s402_s3 }
  0x42   : > { %s337_s20 = sshll.u32 %s1971_s5, 4  ;;  %s400_s5 = sshll.u32 %s398_s15, 4  ;;  %s338_s20 = int_to_ptr.hbm [resolvable:$true] %s337_s20  ;;  %s401_s5 = int_to_ptr.hbm [resolvable:$true] %s400_s5 }
  0x43   : > { %s371_s16 = sshll.u32 %s1972_s9, 4  ;;  %s1433_s9 = sshra.s32 %s401_s5, 4  ;;  %s372_s16 = int_to_ptr.hbm [resolvable:$true] %s371_s16  ;;  %s1434_s9 = int_to_ptr.hbm [resolvable:$true] %s1433_s9 }
  0x44   : > { %1188 = dma.hbm_to_vmem [thread:$0]  (!%p1686_p6), %s338_s20, 512, %s340_s13, [#allocation9], %s1974_s1, %s1974_s1, %s1973_s23  }
  0x45   : > { %1194 = dma.hbm_to_vmem [thread:$0]  (!%p1686_p6), %s372_s16, 512, %s374_s22, [#allocation12], %s1974_s1, %s1974_s1, %s1973_s23  }
  0x46   : > { %s1975_s20 = sand.u32 1, %s1567_s19   ;;  %s1435_s7 = scalar_lea.hbm %s1434_s9, 8 }
  0x47   : > { %s391_s13 = scalar_lea.sflag [#allocation3], %s1975_s20  ;;  %p1436_p1 = scmp.ne.s32.totalorder %s1434_s9, %s1435_s7 }
  0x48   : > { %s1440_s16 = scalar_lea.hbm %s1928_s0, 16  ;;  %p1441_p6 = scmp.lt.s32.totalorder %s1434_s9, %s1928_s0 }
  0x49   : > { %p1438_p8 = pnand %p1436_p1, %p1347_p9  ;;  %p1442_p11 = scmp.lt.s32.totalorder %s1440_s16, %s1435_s7 }
  0x4b   : > { %p1439_p10 = pneg %p1438_p8  ;;  %p1443_p13 = por %p1442_p11, %p1441_p6 }
  0x4d   : > { %p1444_p0 = pnand %p1443_p13, %p1439_p10 }
  0x4f   : > { %1447 = shalt.err (!%p1444_p0)
}
  0x50   : > { %1198 = dma.hbm_to_vmem [thread:$0]  (!%p1739_p7), %s401_s5, 128, %s403_s3, %s391_s13  }
  0x51   : > { %s436_s15 = scalar_lea.hbm %s1930_s2, %s1737_s26  ;;  %s432_s17 = scalar_lea.vmem [#allocation7], %s1734_s14 }
  0x52   : > { %s440_s20 = sshll.u32 %s432_s17, 4  ;;  %s438_s1 = sshll.u32 %s436_s15, 4  ;;  %s441_s20 = int_to_ptr.vmem [resolvable:$true] %s440_s20  ;;  %s439_s1 = int_to_ptr.hbm [resolvable:$true] %s438_s1 }
  0x53   : > { %s1463_s9 = sshra.s32 %s439_s1, 4  ;;  %s1470_s5 = scalar_lea.hbm %s1930_s2, 16  ;;  %s1464_s9 = int_to_ptr.hbm [resolvable:$true] %s1463_s9 }
  0x54   : > { %s1465_s7 = scalar_lea.hbm %s1464_s9, 8  ;;  %p1471_p10 = scmp.lt.s32.totalorder %s1464_s9, %s1930_s2 }
  0x55   : > { %p1466_p2 = scmp.ne.s32.totalorder %s1464_s9, %s1465_s7  ;;  %p1472_p6 = scmp.lt.s32.totalorder %s1470_s5, %s1465_s7 }
  0x57   : > { %p1468_p1 = pnand %p1466_p2, %p1347_p9  ;;  %p1473_p11 = por %p1472_p6, %p1471_p10 }
  0x59   : > { %p1469_p8 = pneg %p1468_p1 }
  0x5b   : > { %p1474_p13 = pnand %p1473_p11, %p1469_p8 }
  0x5d   : > { %1477 = shalt.err (!%p1474_p13)
}
  0x5e   : > { %1204 = dma.hbm_to_vmem [thread:$0]  (!%p1739_p7), %s439_s1, 128, %s441_s20, %s1749_s29  }
  0x5f   : > { %449 = sbr.rel (%p1674_p3) target bundleno = 1146 (0x47a), region = 64  ;;  %s1819_s14 = sand.u32 (!%p1674_p3), 1, %s1563_s18  }
  0x60   : > { %s1822_s26 = sshll.u32 (!%p1674_p3), %s1819_s14, 3  ;;  %s452_s23 = scalar_lea.sflag (!%p1674_p3), [#allocation3], %s1819_s14 }
  0x61   : > { %s455_s22 = scalar_lea.vmem (!%p1674_p3), [#allocation2], %s1822_s26 }
  0x64   : > { %1538 = dma.done.wait (%p1717_p12), %s452_s23, 128  }
  0x65   : > { %1540 = vsyncadd (%p1717_p12), %s452_s23, 4294967168  ;;  %s461_s25 = sand.u32 1, %s1669_s24   ;;  %s465_s28 = scalar_lea.vmem [#allocation5], %s1822_s26 }
  0x66   : > { %s462_s29 = scalar_lea.sflag [#allocation6], %s461_s25 }
  0x67   : > { %1542 = dma.done.wait (%p1717_p12), %s462_s29, 256  }
  0x68   : > { %1544 = vsyncadd (%p1717_p12), %s462_s29, 4294967040  ;;  %s475_s10 = scalar_lea.vmem [#allocation7], %s1822_s26  ;;  %p1976_p3 = scmp.eq.s32.totalorder %s1669_s24, 0 }
  0x6a   : > { %1546 = dma.done.wait (%p1976_p3), [#allocation9], 1024   ;;  %p1977_p7 = pmov %p1976_p3 }
  0x6b   : > { %p1978_p9 = pmov %p1976_p3 }
  0x6c   : > { %1548 = vsyncadd (%p1977_p7), [#allocation9], 4294966272 }
  0x6d   : > { %1550 = dma.done.wait (%p1978_p9), [#allocation12], 1024   ;;  %p1979_p0 = pmov %p1976_p3 }
  0x6e   : > { %v584_v0 = vld [vmem:[#allocation10 + $0x18] sm:$0xff]  ;;  %v583_v2 = vld [vmem:[#allocation10 + $0x10] sm:$0xff]  ;;  %v582_v4 = vld [vmem:[#allocation10 + $0x8] sm:$0xff]  ;;  %vm556_vm0 = vcmask 261120   ;;  %vm643_vm1 = vcmask 64512   ;;  %s1579_s20 = smov 104  }
  0x6f   : > { %1552 = vsyncadd (%p1979_p0), [#allocation12], 4294966272  ;;  %v551_v1 = vld [vmem:[#allocation8 + $0x18] sm:$0xff]  ;;  %604 = vmatpush.msra.mxu1 %v584_v0  ;;  %v550_v3 = vld [vmem:[#allocation8 + $0x10] sm:$0xff]  ;;  %s1580_s1 = smov 120   ;;  %s1581_s9 = smov 112  }
  0x70   : > { %572 = vmatpush.msra.mxu0 %v551_v1  ;;  %v549_v5 = vld [vmem:[#allocation8 + $0x8] sm:$0xff]  ;;  %v581_v6 = vld [vmem:[#allocation10] sm:$0xff]  ;;  %v545_v9 = vld [vmem:[%s455_s22] sm:$0xff]  ;;  %s1582_s16 = smov 16   ;;  %s1583_s5 = smov 8   ;;  %vm913_vm2 = vcmask 130048  }
  0x71   : > { %605 = vmatpush.msra.mxu1 %v583_v2  ;;  %v548_v7 = vld [vmem:[#allocation8] sm:$0xff]  ;;  %v1263_v10 = vld [vmem:[%s1934_s6] ss:$0 sm:$0xff]  ;;  %v615_v17 = vld [vmem:[#allocation11 + $0x18] sm:$0xff]  ;;  %s1584_s3 = smov 24   ;;  %vm915_vm3 = vcmask 195584  }
  0x72   : > { %573 = vmatpush.msra.mxu0 %v550_v3  ;;  %v546_v8 = vld [vmem:[%s465_s28] sm:$0xff]  ;;  %v1264_v11 = vld [vmem:[%s1932_s4] ss:$0 sm:$0xff]  ;;  %635 = vmatpush.msra.mxu2 %v615_v17  ;;  %s1155_s13 = sshll.u32 %s1669_s24, 3  ;;  %s544_s27 = scalar_lea.vmem [#allocation14], %s1822_s26 }
  0x73   : > { %606 = vmatpush.msra.mxu1 %v582_v4  ;;  %v614_v18 = vld [vmem:[#allocation11 + $0x10] sm:$0xff]  ;;  %v613_v19 = vld [vmem:[#allocation11 + $0x8] sm:$0xff]  ;;  %v612_v20 = vld [vmem:[#allocation11] sm:$0xff]  ;;  %s960_s25 = scalar_lea.hbm %s1939_s11, %s1155_s13  ;;  %s962_s21 = sshll.u32 %s544_s27, 4  ;;  %s963_s21 = int_to_ptr.vmem [resolvable:$true] %s962_s21 }
  0x74   : > { %574 = vmatpush.msra.mxu0 %v549_v5  ;;  %636 = vmatpush.msra.mxu2 %v614_v18  ;;  %v547_v21 = vld [vmem:[%s475_s10] sm:$0xff]  ;;  %v917_v17 = vld [vmem:[#allocation13] sm:$0xff]  ;;  %s1980_s10 = sld [smem:[#allocation30_spill]]  ;;  %s964_s15 = sshll.u32 %s960_s25, 4  ;;  %s965_s15 = int_to_ptr.hbm [resolvable:$true] %s964_s15 }
  0x75   : > { %607 = vmatpush.msra.mxu1 %v581_v6  ;;  %v1265_v30 = vld [vmem:[%s1936_s8] ss:$0 sm:$0xff]  ;;  %s950_s17 = scalar_lea.sflag [#allocation4], %s1819_s14  ;;  %s1507_s24 = sshra.s32 %s965_s15, 4  ;;  %s1508_s24 = int_to_ptr.hbm [resolvable:$true] %s1507_s24 }
  0x76   : > { %575 = vmatpush.msra.mxu0 %v548_v7  ;;  %1139 = vmatmul.msk.f32.vlgmr.msra.gmra.mxu1 %vm556_vm0, %v546_v8  ;;  %s1513_s26 = scalar_lea.hbm %s1939_s11, 16  ;;  %p1514_p8 = scmp.lt.s32.totalorder %s1508_s24, %s1939_s11 }
  0x77   : > { %1138 = vmatmul.msk.f32.vlgmr.msra.gmra.mxu0 %vm556_vm0, %v545_v9  ;;  %637 = vmatpush.msra.mxu2 %v613_v19 }
  0x79   : > { %638 = vmatpush.msra.mxu2 %v612_v20 }
  0x7a   : > { %1140 = vmatmul.msk.f32.vlgmr.msra.gmra.mxu2 %vm556_vm0, %v547_v21 }
  0xf3   : > { %v609_v12 = vpop.f32.mrf.mxu1 }
  0xf4   : > { %v577_v13 = vpop.f32.mrf.mxu0  ;;  %v610_v14 = vadd.f32 %v1263_v10, %v609_v12 }
  0xf5   : > { %v578_v15 = vadd.f32 %v1264_v11, %v577_v13 }
  0xf6   : > { %837 = vrot.lane.b32.xlu2 %v610_v14, %s1579_s20  ;;  %706 = vrot.lane.b32.xlu1 %v610_v14, %s1580_s1 }
  0xf7   : > { %v580_v16 = vmul.f32 0.35355338, %v578_v15  ;;  %772 = vrot.lane.b32.xlu0 %v610_v14, %s1581_s9  ;;  %1141 = vmatpush.xpose.msk.msra.mxu3 %vm643_vm1, %v610_v14  ;;  %v920_v14 = vld [vmem:[#allocation13 + $0x18] sm:$0xff]  ;;  %v919_v15 = vld [vmem:[#allocation13 + $0x10] sm:$0xff] }
  0xfa   : > { %1142 = vmatmul.msk.f32.vlgmr.msra.gmra.mxu3 %vm643_vm1, %v580_v16 }
  0xfd   : > { %v640_v31 = vpop.f32.mrf.mxu2 }
  0xfe   : > { %835 = vrot.lane.b32.xlu2 %v580_v16, %s1579_s20  ;;  %704 = vrot.lane.b32.xlu1 %v580_v16, %s1580_s1  ;;  %v641_v32 = vadd.f32 %v1265_v30, %v640_v31 }
  0xff   : > { %770 = vrot.lane.b32.xlu0 %v580_v16, %s1581_s9  ;;  %v918_v16 = vld [vmem:[#allocation13 + $0x8] sm:$0xff] }
 0x100   : > { %699 = vmatpush.msrb.mxu3 %v641_v32 }
 0x150   : > { %v838_v23 = vpop.permute.xlu2 %837 }
 0x158   : > { %v836_v27 = vpop.permute.xlu2 %835 }
 0x168   : > { %v707_v22 = vpop.permute.xlu1 %706 }
 0x169   : > { %v773_v24 = vpop.permute.xlu0 %772  ;;  %1144 = vmatpush.xpose.msk.msrb.mxu0 %vm643_vm1, %v707_v22 }
 0x16a   : > { %1147 = vmatpush.xpose.msk.msrb.mxu2 %vm643_vm1, %v773_v24  ;;  %v1266_v24 = vld [vmem:[%s1980_s10] ss:$0 sm:$0xff] }
 0x16d   : > { %1150 = vmatpush.xpose.msk.msra.mxu0 %vm643_vm1, %v838_v23 }
 0x16e   : > { %940 = vmatpush.msra.mxu2 %v920_v14 }
 0x170   : > { %v705_v25 = vpop.permute.xlu1 %704  ;;  %941 = vmatpush.msra.mxu2 %v919_v15 }
 0x171   : > { %v771_v26 = vpop.permute.xlu0 %770  ;;  %1145 = vmatmul.msk.f32.vlgmr.msrb.gmra.mxu0 %vm643_vm1, %v705_v25 }
 0x172   : > { %1148 = vmatmul.msk.f32.vlgmr.msrb.gmra.mxu2 %vm643_vm1, %v771_v26 }
 0x173   : > { %942 = vmatpush.msra.mxu2 %v918_v16 }
 0x175   : > { %943 = vmatpush.msra.mxu2 %v917_v17 }
 0x179   : > { %1151 = vmatmul.msk.f32.vlgmr.msra.gmra.mxu0 %vm643_vm1, %v836_v27 }
 0x17d   : > { %v667_v28 = vpop.f32.mrf.mxu3 }
 0x17e   : > { %v670_v29 = vsel %vm643_vm1, %v667_v28, -inf }
 0x17f   : > { %671 = vmax.xlane.f32.xlu0 %v670_v29 }
 0x1ee   : > { %v729_v33 = vpop.f32.mrf.mxu0 }
 0x1ef   : > { %v732_v34 = vsel %vm643_vm1, %v729_v33, -inf }
 0x1f0   : > { %733 = vmax.xlane.f32.xlu1 %v732_v34 }
 0x1f2   : > { %v672_v35 = vpop.xlane.xlu0 %671 }
 0x1f3   : > { %v673_v36 = vsub.f32 %v667_v28, %v672_v35 }
 0x1f5   : > { %v674_v37 = vmul.f32 1.442695, %v673_v36  ;;  %v795_v38 = vpop.f32.mrf.mxu2 }
 0x1f6   : > { %v798_v39 = vsel %vm643_vm1, %v795_v38, -inf  ;;  %v860_v40 = vpop.f32.mrf.mxu0 }
 0x1f7   : > { %1267 = vpow2.f32 %v674_v37  ;;  %799 = vmax.xlane.f32.xlu2 %v798_v39  ;;  %v863_v42 = vsel %vm643_vm1, %v860_v40, -inf }
 0x1fd   : > { %v1268_v41 = vpop.eup %1267 }
 0x1fe   : > { %v676_v43 = vsel %vm643_vm1, %v1268_v41, 0.0 }
 0x1ff   : > { %864 = vmax.xlane.f32.xlu2 %v863_v42  ;;  %677 = vadd.xlane.f32.xlu0 %v676_v43 }
 0x263   : > { %v734_v44 = vpop.xlane.xlu1 %733 }
 0x264   : > { %v735_v45 = vsub.f32 %v729_v33, %v734_v44 }
 0x266   : > { %v736_v46 = vmul.f32 1.442695, %v735_v45 }
 0x268   : > { %1269 = vpow2.f32 %v736_v46 }
 0x26a   : > { %v800_v47 = vpop.xlane.xlu2 %799 }
 0x26b   : > { %v801_v48 = vsub.f32 %v795_v38, %v800_v47 }
 0x26d   : > { %v802_v49 = vmul.f32 1.442695, %v801_v48 }
 0x26e   : > { %v1270_v50 = vpop.eup %1269 }
 0x26f   : > { %1271 = vpow2.f32 %v802_v49  ;;  %v738_v51 = vsel %vm643_vm1, %v1270_v50, 0.0 }
 0x270   : > { %739 = vadd.xlane.f32.xlu1 %v738_v51 }
 0x272   : > { %v865_v52 = vpop.xlane.xlu2 %864  ;;  %v678_v53 = vpop.xlane.xlu0 %677 }
 0x273   : > { %v866_v54 = vsub.f32 %v860_v40, %v865_v52  ;;  %1273 = vrcp.f32 %v678_v53 }
 0x275   : > { %v1272_v55 = vpop.eup %1271  ;;  %v867_v56 = vmul.f32 1.442695, %v866_v54 }
 0x276   : > { %v804_v57 = vsel %vm643_vm1, %v1272_v55, 0.0 }
 0x277   : > { %1275 = vpow2.f32 %v867_v56  ;;  %805 = vadd.xlane.f32.xlu2 %v804_v57 }
 0x279   : > { %v1274_v58 = vpop.eup %1273 }
 0x27a   : > { %v680_v59 = vmul.f32 %v1274_v58, %v1268_v41 }
 0x27c   : > { %1143 = vmatmul.msk.f32.vlgmr.msrb.gmra.mxu3 %vm643_vm1, %v680_v59 }
 0x27d   : > { %v1276_v60 = vpop.eup %1275 }
 0x27e   : > { %v869_v61 = vsel %vm643_vm1, %v1276_v60, 0.0 }
 0x27f   : > { %870 = vadd.xlane.f32.xlu0 %v869_v61 }
 0x289   : > { %744 = vrot.lane.b32.xlu1 %v641_v32, %s1580_s1 }
 0x28f   : > { %809 = vrot.lane.b32.xlu2 %v641_v32, %s1581_s9 }
 0x293   : > { %874 = vrot.lane.b32.xlu0 %v641_v32, %s1579_s20  ;;  %s1509_s20 = scalar_lea.hbm %s1508_s24, 8 }
 0x294   : > { %p1510_p12 = scmp.ne.s32.totalorder %s1508_s24, %s1509_s20  ;;  %p1515_p10 = scmp.lt.s32.totalorder %s1513_s26, %s1509_s20 }
 0x296   : > { %p1511_p2 = pnand %p1510_p12, %p1724_p4  ;;  %p1516_p6 = por %p1515_p10, %p1514_p8 }
 0x298   : > { %p1512_p1 = pneg %p1511_p2 }
 0x29a   : > { %p1517_p11 = pnand %p1516_p6, %p1512_p1 }
 0x2e3   : > { %v740_v63 = vpop.xlane.xlu1 %739 }
 0x2ea   : > { %v806_v62 = vpop.xlane.xlu2 %805 }
 0x2eb   : > { %1277 = vrcp.f32 %v806_v62 }
 0x2ec   : > { %1279 = vrcp.f32 %v740_v63 }
 0x2f1   : > { %v1278_v0 = vpop.eup %1277 }
 0x2f2   : > { %v808_v1 = vmul.f32 %v1278_v0, %v1272_v55  ;;  %v810_v2 = vpop.permute.xlu2 %809  ;;  %v1280_v3 = vpop.eup %1279 }
 0x2f3   : > { %830 = vmatpush.msra.mxu3 %v810_v2  ;;  %v871_v4 = vpop.xlane.xlu0 %870  ;;  %v742_v6 = vmul.f32 %v1280_v3, %v1270_v50 }
 0x2f4   : > { %1149 = vmatmul.msk.f32.vlgmr.msra.gmra.mxu3 %vm643_vm1, %v808_v1  ;;  %1281 = vrcp.f32 %v871_v4 }
 0x2fa   : > { %v1282_v7 = vpop.eup %1281 }
 0x2fb   : > { %v745_v5 = vpop.permute.xlu1 %744  ;;  %v873_v8 = vmul.f32 %v1282_v7, %v1276_v60 }
 0x2fc   : > { %765 = vmatpush.msrb.mxu1 %v745_v5 }
 0x2fd   : > { %1146 = vmatmul.msk.f32.vlgmr.msrb.gmra.mxu1 %vm643_vm1, %v742_v6 }
 0x2ff   : > { %v701_v10 = vpop.f32.mrf.mxu3 }
 0x305   : > { %v875_v9 = vpop.permute.xlu0 %874 }
 0x306   : > { %895 = vmatpush.msra.mxu1 %v875_v9 }
 0x307   : > { %1152 = vmatmul.msk.f32.vlgmr.msra.gmra.mxu1 %vm643_vm1, %v873_v8 }
 0x377   : > { %v832_v11 = vpop.f32.mrf.mxu3 }
 0x378   : > { %905 = vrot.lane.b32.xlu0 %v832_v11, %s1582_s16 }
 0x37a   : > { %v767_v12 = vpop.f32.mrf.mxu1 }
 0x37b   : > { %901 = vrot.lane.b32.xlu1 %v767_v12, %s1583_s5 }
 0x384   : > { %v897_v13 = vpop.f32.mrf.mxu1 }
 0x385   : > { %909 = vrot.lane.b32.xlu2 %v897_v13, %s1584_s3 }
 0x3df   : > { %v910_v21 = vpop.permute.xlu2 %909 }
 0x3ea   : > { %v906_v19 = vpop.permute.xlu0 %905 }
 0x3ed   : > { %v902_v18 = vpop.permute.xlu1 %901 }
 0x3ee   : > { %v912_v20 = vsel %vm643_vm1, %v701_v10, %v902_v18 }
 0x3ef   : > { %v914_v22 = vsel %vm913_vm2, %v912_v20, %v906_v19 }
 0x3f0   : > { %v916_v23 = vsel %vm915_vm3, %v914_v22, %v910_v21 }
 0x3f1   : > { %1153 = vmatmul.msk.f32.vlgmr.msra.gmra.mxu2 %vm556_vm0, %v916_v23 }
 0x474   : > { %v945_v25 = vpop.f32.mrf.mxu2 }
 0x475   : > { %v946_v26 = vadd.f32 %v1266_v24, %v945_v25 }
 0x477   : > { %948 = vst.msk [vmem:[%s544_s27] sm:$0xff] %vm556_vm0, %v946_v26 }
 0x478   : > { %1520 = shalt.err (!%p1517_p11)
}
 0x479   : > { %1180 = dma.vmem_to_hbm [thread:$0]  (%p1724_p4), %s963_s21, 128, %s965_s15, %s950_s17  }
 0x47a PF: > { %s1981_s14 = sld [smem:[#allocation20_spill]] }
 0x47b   : > { %s1983_s5 = sld [smem:[#allocation21_spill]] }
 0x480   : > { %s976_s3 = sand.u32 1, %s1981_s14  }
 0x481   : > { %p1984_p13 = scmp.ge.s32.totalorder %s1983_s5, 2  ;;  %s977_s13 = scalar_lea.sflag [#allocation4], %s976_s3 }
 0x483   : > { %p1206_p3 = pnand %p1984_p13, %p1728_p5 }
 0x485   : > { %p1207_p7 = pneg %p1206_p3 }
 0x487   : > { %1554 = dma.done.wait (%p1207_p7), %s977_s13, 128  }
 0x488   : > { %1556 = vsyncadd (%p1207_p7), %s977_s13, 4294967168  ;;  %s1985_s20 = sld [smem:[#allocation22_spill]]  ;;  %s1987_s17 = smov %s1563_s18 }
 0x489   : > { %s1986_s23 = sld [smem:[#allocation23_spill]]  ;;  %s1988_s18 = smov %s1567_s19 }
 0x48e   : > { %p29_p9 = scmp.ge.s32.totalorder %s1985_s20, 4  }
 0x48f   : > { %s1989_s19 = smov %s1986_s23 }
 0x490   :  { %31 = sbr.rel (!%p29_p9) target bundleno = 16 (0x10), region = 149 }
 0x495   :  { %983 = vsyncpa [#allocation3], 1 }
 0x496   :  { %985 = vsyncpa [#allocation3 + $0x1], 1 }
 0x497   :  { %986 = vsyncpa [#allocation6], 1 }
 0x498   :  { %988 = vsyncpa [#allocation6 + $0x1], 1 }
 0x499   :  { %989 = vsyncpa [#allocation9], 1 }
 0x49a   :  { %990 = vsyncpa [#allocation12], 1 }
 0x49b   :  { %991 = vsyncpa [#allocation4], 1 }
 0x49c   :  { %993 = vsyncpa [#allocation4 + $0x1], 1 }

</bundles_post_ra>
